<compile_context>
chip_gen: v7x
topology: tpu7x:2x2x1
jax: 0.10.0
libtpu: 0.0.40
codegen_flags: <defaults>
</compile_context>

<pallas_src>
import functools

import jax
import jax.numpy as jnp
from jax.experimental import pallas as pl
from jax.experimental.pallas import tpu as pltpu


def conv3x3_sigmoid_kernel(w_ref, b_ref, x_ref, o_ref, *, H, W):
    # w_ref : (9,) f32 SMEM  — 3x3 taps, row-major (w[ki*3 + kj])
    # b_ref : (1,) f32 SMEM
    # x_ref : (N, H*W) f32 VMEM — whole batch, flattened lane-dense
    # o_ref : (N, H*W) f32 VMEM
    N, L = o_ref.shape
    x = x_ref[...]

    # Boundary masks on the flattened index.  Row edges are pure comparisons on the
    # flat position; column edges need pos mod W (bit-trick when W is a power of 2,
    # so no vector integer division is required here).
    pos = jax.lax.broadcasted_iota(jnp.int32, (N, L), 1)
    if W & (W - 1) == 0:
        colm = jax.lax.bitwise_and(pos, W - 1)
    else:
        colm = jax.lax.rem(pos, W)
    not_left = colm != 0                  # a j-1 neighbour exists
    not_right = colm != (W - 1)           # a j+1 neighbour exists
    not_top = pos >= W                    # an i-1 neighbour exists
    not_bottom = pos < (H - 1) * W        # an i+1 neighbour exists

    # Accumulator starts at the bias.
    acc = jnp.full((N, L), b_ref[0], dtype=jnp.float32)

    # 3x3 conv as 9 rolled multiply-adds over the whole batch in one pass.
    # Tap (di, dj) reads x[i+di, j+dj] == x_flat[p + di*W + dj]; pltpu.roll follows
    # jnp.roll semantics (result[p] = x[p - shift]), so shift = (-(di*W + dj)) % L.
    for ki in range(3):
        for kj in range(3):
            di, dj = ki - 1, kj - 1
            wk = w_ref[ki * 3 + kj]
            s = di * W + dj
            if s == 0:
                tap = x
            else:
                tap = pltpu.roll(x, (-s) % L, 1)
            mask = None
            if di == -1:
                mask = not_top
            elif di == 1:
                mask = not_bottom
            if dj == -1:
                mask = not_left if mask is None else jnp.logical_and(mask, not_left)
            elif dj == 1:
                mask = not_right if mask is None else jnp.logical_and(mask, not_right)
            if mask is not None:
                tap = jnp.where(mask, tap, 0.0)
            acc = acc + wk * tap

    o_ref[...] = jax.nn.sigmoid(acc)


def _conv3x3_sigmoid_flat(x_flat, weight, bias, H, W):
    """x_flat: (N, H*W) f32.  weight: (1,1,3,3).  bias: (1,).  Returns (N, H*W) f32."""
    N, L = x_flat.shape
    assert L == H * W
    w_flat = weight.reshape(9).astype(jnp.float32)
    b = bias.reshape(1).astype(jnp.float32)

    kernel = functools.partial(conv3x3_sigmoid_kernel, H=H, W=W)

    return pl.pallas_call(
        kernel,
        out_shape=jax.ShapeDtypeStruct((N, L), jnp.float32),
        grid_spec=pltpu.PrefetchScalarGridSpec(
            num_scalar_prefetch=0,
            grid=(1,),                                   # single fat step: whole batch
            in_specs=[
                pl.BlockSpec(memory_space=pltpu.SMEM),   # weights (9,)
                pl.BlockSpec(memory_space=pltpu.SMEM),   # bias (1,)
                pl.BlockSpec((N, L), lambda i: (0, 0)),  # whole input, lane-dense
            ],
            out_specs=pl.BlockSpec((N, L), lambda i: (0, 0)),
        ),
        compiler_params=pltpu.CompilerParams(
            dimension_semantics=("arbitrary",)),
    )(w_flat, b, x_flat)


def bbox_encoder_forward(x_nchw, weight, bias):
    """Conv2d(1,1,3,padding='same') + Sigmoid.

    x_nchw: (N, 1, H, W).  weight: (1, 1, 3, 3).  bias: (1,).  Returns (N, 1, H, W) f32.
    """
    N, C, H, W = x_nchw.shape
    assert C == 1, "BboxEncoder conv has in_channels=1"
    x_flat = x_nchw.astype(jnp.float32).reshape(N, H * W)   # single layout-trivial reshape
    out_flat = _conv3x3_sigmoid_flat(x_flat, weight, bias, H, W)
    return out_flat.reshape(N, 1, H, W)


def ancillary_bbox_branch(bbox, weight, bias):
    """Mirrors AncillaryModel.forward's bbox path: unsqueeze(1).float() -> encoder.

    The unsqueeze is folded into the single post-kernel reshape.
    """
    N, H, W = bbox.shape
    x_flat = bbox.astype(jnp.float32).reshape(N, H * W)
    out_flat = _conv3x3_sigmoid_flat(x_flat, weight, bias, H, W)
    return out_flat.reshape(N, 1, H, W)


def _reference(x_nchw, weight, bias):
    y = jax.lax.conv_general_dilated(
        x_nchw, weight, window_strides=(1, 1), padding="SAME",
        dimension_numbers=("NCHW", "OIHW", "NCHW"))
    return jax.nn.sigmoid(y + bias.reshape(1, 1, 1, 1))


if __name__ == "__main__":
    key = jax.random.PRNGKey(0)
    k_x, k_w, k_b = jax.random.split(key, 3)

    N, H, W = 2, 16, 16
    bbox = jax.random.normal(k_x, (N, H, W), dtype=jnp.float32)

    # PyTorch Conv2d default init bound: 1/sqrt(fan_in) = 1/3 for 1x3x3.
    bound = 1.0 / 3.0
    weight = jax.random.uniform(k_w, (1, 1, 3, 3), minval=-bound, maxval=bound,
                                dtype=jnp.float32)
    bias = jax.random.uniform(k_b, (1,), minval=-bound, maxval=bound,
                              dtype=jnp.float32)

    out = jax.jit(ancillary_bbox_branch)(bbox, weight, bias)
    out = jax.block_until_ready(out)

    ref = _reference(bbox[:, None, :, :], weight, bias)
    assert out.shape == (N, 1, H, W)
    assert jnp.allclose(out, ref, atol=1e-5, rtol=1e-5)

    print("KERNEL_OK")
</pallas_src>

<mosaic_0001>
module attributes {stable_mosaic.version = 11 : i64} {
  func.func @conv3x3_sigmoid_kernel(%arg0: i32, %arg1: memref<9xf32, #tpu.memory_space<smem>>, %arg2: memref<1xf32, #tpu.memory_space<smem>>, %arg3: memref<2x256xf32, #tpu.memory_space<vmem>>, %arg4: memref<2x256xf32, #tpu.memory_space<vmem>>) attributes {dimension_semantics = [#tpu.dimension_semantics<arbitrary>], iteration_bounds = array<i64: 1>, scalar_prefetch = 0 : i64, scratch_operands = 0 : i64, tpu.core_type = #tpu.core_type<tc>, window_params = [{transform_indices = @transform_0, window_bounds = array<i64: 9>}, {transform_indices = @transform_1, window_bounds = array<i64: 1>}, {pipeline_mode = #tpu.pipeline_mode<synchronous>, transform_indices = @transform_2, window_bounds = array<i64: 2, 256>}, {pipeline_mode = #tpu.pipeline_mode<synchronous>, transform_indices = @transform_3, window_bounds = array<i64: 2, 256>}]} {
    %c0 = arith.constant 0 : index
    %c0_0 = arith.constant 0 : index
    %0 = vector.load %arg3[%c0, %c0_0] : memref<2x256xf32, #tpu.memory_space<vmem>>, vector<2x256xf32>
    %1 = tpu.iota {dimensions = array<i32: 1>} : vector<2x256xi32>
    %c15_i32 = arith.constant 15 : i32
    %2 = vector.broadcast %c15_i32 : i32 to vector<2x256xi32>
    %3 = arith.andi %1, %2 : vector<2x256xi32>
    %c0_i32 = arith.constant 0 : i32
    %4 = vector.broadcast %c0_i32 : i32 to vector<2x256xi32>
    %5 = arith.cmpi ne, %3, %4 : vector<2x256xi32>
    %c15_i32_1 = arith.constant 15 : i32
    %6 = vector.broadcast %c15_i32_1 : i32 to vector<2x256xi32>
    %7 = arith.cmpi ne, %3, %6 : vector<2x256xi32>
    %c16_i32 = arith.constant 16 : i32
    %8 = vector.broadcast %c16_i32 : i32 to vector<2x256xi32>
    %9 = arith.cmpi sge, %1, %8 : vector<2x256xi32>
    %c240_i32 = arith.constant 240 : i32
    %10 = vector.broadcast %c240_i32 : i32 to vector<2x256xi32>
    %11 = arith.cmpi slt, %1, %10 : vector<2x256xi32>
    %c0_2 = arith.constant 0 : index
    %12 = memref.load %arg2[%c0_2] : memref<1xf32, #tpu.memory_space<smem>>
    %13 = vector.broadcast %12 : f32 to vector<2x256xf32>
    %c0_3 = arith.constant 0 : index
    %14 = memref.load %arg1[%c0_3] : memref<9xf32, #tpu.memory_space<smem>>
    %c17_i32 = arith.constant 17 : i32
    %15 = tpu.dynamic_rotate %0 by %c17_i32 dim 1 : vector<2x256xf32>, i32 -> vector<2x256xf32>
    %16 = arith.andi %9, %5 : vector<2x256xi1>
    %cst = arith.constant 0.000000e+00 : f32
    %17 = vector.broadcast %cst : f32 to vector<2x256xf32>
    %18 = arith.select %16, %15, %17 : vector<2x256xi1>, vector<2x256xf32>
    %19 = vector.broadcast %14 : f32 to vector<2x256xf32>
    %20 = arith.mulf %19, %18 : vector<2x256xf32>
    %21 = arith.addf %13, %20 : vector<2x256xf32>
    %c1 = arith.constant 1 : index
    %22 = memref.load %arg1[%c1] : memref<9xf32, #tpu.memory_space<smem>>
    %c16_i32_4 = arith.constant 16 : i32
    %23 = tpu.dynamic_rotate %0 by %c16_i32_4 dim 1 : vector<2x256xf32>, i32 -> vector<2x256xf32>
    %cst_5 = arith.constant 0.000000e+00 : f32
    %24 = vector.broadcast %cst_5 : f32 to vector<2x256xf32>
    %25 = arith.select %9, %23, %24 : vector<2x256xi1>, vector<2x256xf32>
    %26 = vector.broadcast %22 : f32 to vector<2x256xf32>
    %27 = arith.mulf %26, %25 : vector<2x256xf32>
    %28 = arith.addf %21, %27 : vector<2x256xf32>
    %c2 = arith.constant 2 : index
    %29 = memref.load %arg1[%c2] : memref<9xf32, #tpu.memory_space<smem>>
    %c15_i32_6 = arith.constant 15 : i32
    %30 = tpu.dynamic_rotate %0 by %c15_i32_6 dim 1 : vector<2x256xf32>, i32 -> vector<2x256xf32>
    %31 = arith.andi %9, %7 : vector<2x256xi1>
    %cst_7 = arith.constant 0.000000e+00 : f32
    %32 = vector.broadcast %cst_7 : f32 to vector<2x256xf32>
    %33 = arith.select %31, %30, %32 : vector<2x256xi1>, vector<2x256xf32>
    %34 = vector.broadcast %29 : f32 to vector<2x256xf32>
    %35 = arith.mulf %34, %33 : vector<2x256xf32>
    %36 = arith.addf %28, %35 : vector<2x256xf32>
    %c3 = arith.constant 3 : index
    %37 = memref.load %arg1[%c3] : memref<9xf32, #tpu.memory_space<smem>>
    %c1_i32 = arith.constant 1 : i32
    %38 = tpu.dynamic_rotate %0 by %c1_i32 dim 1 : vector<2x256xf32>, i32 -> vector<2x256xf32>
    %cst_8 = arith.constant 0.000000e+00 : f32
    %39 = vector.broadcast %cst_8 : f32 to vector<2x256xf32>
    %40 = arith.select %5, %38, %39 : vector<2x256xi1>, vector<2x256xf32>
    %41 = vector.broadcast %37 : f32 to vector<2x256xf32>
    %42 = arith.mulf %41, %40 : vector<2x256xf32>
    %43 = arith.addf %36, %42 : vector<2x256xf32>
    %c4 = arith.constant 4 : index
    %44 = memref.load %arg1[%c4] : memref<9xf32, #tpu.memory_space<smem>>
    %45 = vector.broadcast %44 : f32 to vector<2x256xf32>
    %46 = arith.mulf %45, %0 : vector<2x256xf32>
    %47 = arith.addf %43, %46 : vector<2x256xf32>
    %c5 = arith.constant 5 : index
    %48 = memref.load %arg1[%c5] : memref<9xf32, #tpu.memory_space<smem>>
    %c255_i32 = arith.constant 255 : i32
    %49 = tpu.dynamic_rotate %0 by %c255_i32 dim 1 : vector<2x256xf32>, i32 -> vector<2x256xf32>
    %cst_9 = arith.constant 0.000000e+00 : f32
    %50 = vector.broadcast %cst_9 : f32 to vector<2x256xf32>
    %51 = arith.select %7, %49, %50 : vector<2x256xi1>, vector<2x256xf32>
    %52 = vector.broadcast %48 : f32 to vector<2x256xf32>
    %53 = arith.mulf %52, %51 : vector<2x256xf32>
    %54 = arith.addf %47, %53 : vector<2x256xf32>
    %c6 = arith.constant 6 : index
    %55 = memref.load %arg1[%c6] : memref<9xf32, #tpu.memory_space<smem>>
    %c241_i32 = arith.constant 241 : i32
    %56 = tpu.dynamic_rotate %0 by %c241_i32 dim 1 : vector<2x256xf32>, i32 -> vector<2x256xf32>
    %57 = arith.andi %11, %5 : vector<2x256xi1>
    %cst_10 = arith.constant 0.000000e+00 : f32
    %58 = vector.broadcast %cst_10 : f32 to vector<2x256xf32>
    %59 = arith.select %57, %56, %58 : vector<2x256xi1>, vector<2x256xf32>
    %60 = vector.broadcast %55 : f32 to vector<2x256xf32>
    %61 = arith.mulf %60, %59 : vector<2x256xf32>
    %62 = arith.addf %54, %61 : vector<2x256xf32>
    %c7 = arith.constant 7 : index
    %63 = memref.load %arg1[%c7] : memref<9xf32, #tpu.memory_space<smem>>
    %c240_i32_11 = arith.constant 240 : i32
    %64 = tpu.dynamic_rotate %0 by %c240_i32_11 dim 1 : vector<2x256xf32>, i32 -> vector<2x256xf32>
    %cst_12 = arith.constant 0.000000e+00 : f32
    %65 = vector.broadcast %cst_12 : f32 to vector<2x256xf32>
    %66 = arith.select %11, %64, %65 : vector<2x256xi1>, vector<2x256xf32>
    %67 = vector.broadcast %63 : f32 to vector<2x256xf32>
    %68 = arith.mulf %67, %66 : vector<2x256xf32>
    %69 = arith.addf %62, %68 : vector<2x256xf32>
    %c8 = arith.constant 8 : index
    %70 = memref.load %arg1[%c8] : memref<9xf32, #tpu.memory_space<smem>>
    %c239_i32 = arith.constant 239 : i32
    %71 = tpu.dynamic_rotate %0 by %c239_i32 dim 1 : vector<2x256xf32>, i32 -> vector<2x256xf32>
    %72 = arith.andi %11, %7 : vector<2x256xi1>
    %cst_13 = arith.constant 0.000000e+00 : f32
    %73 = vector.broadcast %cst_13 : f32 to vector<2x256xf32>
    %74 = arith.select %72, %71, %73 : vector<2x256xi1>, vector<2x256xf32>
    %75 = vector.broadcast %70 : f32 to vector<2x256xf32>
    %76 = arith.mulf %75, %74 : vector<2x256xf32>
    %77 = arith.addf %69, %76 : vector<2x256xf32>
    %78 = arith.negf %77 : vector<2x256xf32>
    %79 = math.exp %78 : vector<2x256xf32>
    %cst_14 = arith.constant 1.000000e+00 : f32
    %80 = vector.broadcast %cst_14 : f32 to vector<2x256xf32>
    %81 = arith.addf %80, %79 : vector<2x256xf32>
    %82 = arith.divf %80, %81 : vector<2x256xf32>
    %c0_15 = arith.constant 0 : index
    %c0_16 = arith.constant 0 : index
    %83 = vector.load %arg4[%c0_15, %c0_16] : memref<2x256xf32, #tpu.memory_space<vmem>>, vector<2x256xf32>
    tpu.vector_store %arg4[%c0_15, %c0_16], %82 {strides = array<i32>} : memref<2x256xf32, #tpu.memory_space<vmem>>, vector<2x256xf32>,
    return
  }
  func.func @transform_0(%arg0: i32) -> i32 {
    %c0_i32 = arith.constant 0 : i32
    %c0_i32_0 = arith.constant 0 : i32
    return %c0_i32 : i32
  }
  func.func @transform_1(%arg0: i32) -> i32 {
    %c0_i32 = arith.constant 0 : i32
    %c0_i32_0 = arith.constant 0 : i32
    return %c0_i32 : i32
  }
  func.func @transform_2(%arg0: i32) -> (i32, i32) {
    %c0_i32 = arith.constant 0 : i32
    %c0_i32_0 = arith.constant 0 : i32
    %c0_i32_1 = arith.constant 0 : i32
    return %c0_i32, %c0_i32_0 : i32, i32
  }
  func.func @transform_3(%arg0: i32) -> (i32, i32) {
    %c0_i32 = arith.constant 0 : i32
    %c0_i32_0 = arith.constant 0 : i32
    %c0_i32_1 = arith.constant 0 : i32
    return %c0_i32, %c0_i32_0 : i32, i32
  }
}

</mosaic_0001>

<bundles_post_ra>
// kernel: ancillary_bbox_branch.1
= control target key start
LH: loop header
LB: loop body
LE: loop exit
PB: predicated region body
PF: predicated region fallthrough
CT: control target
= control target key end

     0   :  { %9 = vsyncpa [#allocation4], 0  ;;  %s437_s0 = inlined_call_operand.vmem [shape: f32[9], index: 0, kind: input, shape index: {}]   ;;  %s438_s1 = inlined_call_operand.<no memory space> [shape: f32[1], index: 1, kind: input, shape index: {}]   ;;  %s439_s2 = inlined_call_operand.vmem [shape: f32[2,256], index: 2, kind: input, shape index: {}]   ;;  %s440_s3 = inlined_call_operand.vmem [shape: f32[2,256], index: 3, kind: output, shape index: {}]  }
   0x1   :  { %s16_s14 = sshll.u32 %s437_s0, 4  ;;  %s17_s14 = int_to_ptr.vmem [resolvable:$true] %s16_s14 }
   0x2   :  { %s257_s15 = scalar_lea.vmem %s17_s14, 16  ;;  %p262_p1 = scmp.lt.s32.totalorder %s17_s14, %s17_s14 }
   0x3   :  { %p258_p0 = scmp.ne.s32.totalorder %s17_s14, %s257_s15  ;;  %p263_p2 = scmp.lt.s32.totalorder %s257_s15, %s257_s15 }
   0x5   :  { %p264_p3 = por %p263_p2, %p262_p1 }
   0x7   :  { %p265_p4 = pnand %p264_p3, %p258_p0 }
   0x9   :  { %268 = shalt.err (!%p265_p4)
}
   0xa   :  { %s271_s16 = smov [#allocation3]  }
   0xb   :  { %19 = dma.vmem_to_smem %s17_s14, 16, %s271_s16, [#allocation4]  }
   0xc   :  { %269 = dma.done.wait [#allocation4], 16  }
   0xd   :  { %270 = vsyncadd [#allocation4], 4294967280 }
   0xe   :  { %27 = sfence }
   0xf   :  { %v29_v0 = vlaneseq  ;;  %v272_v1 = vmov 1983009808   ;;  %v28_v5 = vld [vmem:[%s439_s2] sm:$0xf]  ;;  %s231_s18 = sld [smem:[#allocation3 + $0x4]]  ;;  %s273_s19 = smov 16   ;;  %v43_v37 = vstv %s438_s1 }
  0x10   :  { %v47_v2 = vunpack.c.l.s4 %v272_v1  ;;  %s274_s20 = smov 17   ;;  %s275_s21 = smov 15  }
  0x11   :  { %v50_v3 = vshrl.u32 %v29_v0, 7  ;;  %s276_s22 = smov 1   ;;  %s277_s2 = smov 127   ;;  %v309_v12 = vand.u32 127, %v29_v0 }
  0x12   :  { %v48_v4 = vunpack.c.0.s8 %v47_v2  ;;  %s278_s23 = smov 113   ;;  %s279_s24 = smov 112  }
  0x13   :  { %s280_s25 = smov 111   ;;  %v312_v13 = vadd.s32 128, %v309_v12  ;;  %s314_s26 = sld [smem:[#allocation3 + $0x1]]  ;;  %v32_v16 = vand.u32 15, %v309_v12  ;;  %vm77_vm0 = vcmp.lt.s32.totalorder %v309_v12, 16  ;;  %vm38_vm2 = vcmp.ge.s32.totalorder %v309_v12, 16 }
  0x14   :  { %v51_v6 = vsub.s32 %v48_v4, %v50_v3  ;;  %s317_s27 = sld [smem:[#allocation3]]  ;;  %s321_s28 = sld [smem:[#allocation3 + $0x2]]  ;;  %vm92_vm4 = vcmp.lt.s32.totalorder %v309_v12, 15  ;;  %vm60_vm5 = vcmp.lt.s32.totalorder %v309_v12, 17  ;;  %vm109_vm10 = vcmp.lt.s32.totalorder %v309_v12, 1 }
  0x15   :  { %v120_v9 = vstv %s231_s18  ;;  %v33_v17 = vand.u32 15, %v312_v13  ;;  %s323_s29 = sld [smem:[#allocation3 + $0x3]]  ;;  %vm325_vm1 = vcmp.ne.s32.totalorder %v32_v16, 0  ;;  %vm332_vm3 = vcmp.ne.s32.totalorder %v32_v16, 15  ;;  %s338_s30 = sld [smem:[#allocation3 + $0x5]] }
  0x16   :  { %v52_v7 = vrot.slane %v28_v5, %v51_v6  ;;  %v121_v10 = vmul.f32 %v120_v9, %v28_v5  ;;  %vm352_vm8 = vmand %vm38_vm2, %vm325_vm1  ;;  %s384_s1 = sld [smem:[#allocation3 + $0x6]]  ;;  %vm140_vm11 = vcmp.lt.s32.totalorder %v309_v12, 127  ;;  %s392_s6 = sld [smem:[#allocation3 + $0x7]]  ;;  %vm41_vm12 = vcmp.lt.s32.totalorder %v312_v13, 240 }
  0x17   :  { %vm340_vm6 = vcmp.ne.s32.totalorder %v33_v17, 15  ;;  %vm344_vm7 = vcmp.ne.s32.totalorder %v33_v17, 0  ;;  %vm366_vm9 = vmand %vm38_vm2, %vm332_vm3  ;;  %vm155_vm13 = vcmp.lt.s32.totalorder %v309_v12, 113  ;;  %s415_s7 = sld [smem:[#allocation3 + $0x8]]  ;;  %vm172_vm15 = vcmp.lt.s32.totalorder %v309_v12, 112 }
  0x18   :  { %73 = vrot.lane.b32.xlu1 %v52_v7, %s273_s19  ;;  %56 = vrot.lane.b32.xlu0 %v52_v7, %s274_s20  ;;  %v53_v8 = vcombine.high %v52_v7, %v52_v7  ;;  %v307_v11 = vrot.slane %v121_v10, %v51_v6  ;;  %vm410_vm14 = vmand %vm41_vm12, %vm344_vm7 }
  0x19   :  { %v82_v26 = vstv %s314_s26 }
  0x1a   :  { %v67_v30 = vstv %s317_s27  ;;  %v99_v40 = vstv %s321_s28  ;;  %v130_v0 = vcombine.high %v307_v11, %v307_v11 }
  0x1b   :  { %v114_v43 = vstv %s323_s29  ;;  %v145_v56 = vstv %s338_s30 }
  0x1c   :  { %88 = vrot.lane.b32.xlu0 %v52_v7, %s275_s21  ;;  %75 = vrot.lane.b32.xlu1 %v53_v8, %s273_s19  ;;  %v162_v17 = vstv %s384_s1 }
  0x20   :  { %90 = vrot.lane.b32.xlu1 %v53_v8, %s275_s21  ;;  %58 = vrot.lane.b32.xlu0 %v53_v8, %s274_s20 }
  0x24   :  { %107 = vrot.lane.b32.xlu1 %v53_v8, %s276_s22  ;;  %105 = vrot.lane.b32.xlu0 %v52_v7, %s276_s22 }
  0x28   :  { %138 = vrot.lane.b32.xlu1 %v53_v8, %s277_s2  ;;  %136 = vrot.lane.b32.xlu0 %v52_v7, %s277_s2 }
  0x2c   :  { %153 = vrot.lane.b32.xlu1 %v53_v8, %s278_s23  ;;  %151 = vrot.lane.b32.xlu0 %v52_v7, %s278_s23 }
  0x30   :  { %170 = vrot.lane.b32.xlu1 %v53_v8, %s279_s24  ;;  %168 = vrot.lane.b32.xlu0 %v52_v7, %s279_s24 }
  0x34   :  { %185 = vrot.lane.b32.xlu1 %v53_v8, %s280_s25  ;;  %183 = vrot.lane.b32.xlu0 %v52_v7, %s280_s25 }
  0x8a   :  { %v74_v14 = vpop.permute.xlu1 %73  ;;  %v57_v15 = vpop.permute.xlu0 %56 }
  0x8e   :  { %v89_v18 = vpop.permute.xlu0 %88  ;;  %v76_v19 = vpop.permute.xlu1 %75 }
  0x8f   :  { %v79_v21 = vsel %vm77_vm0, %v76_v19, %v74_v14  ;;  %v78_v27 = vsel %vm77_vm0, %v74_v14, %v76_v19  ;;  %vm187_vm0 = vcmp.lt.s32.totalorder %v309_v12, 111 }
  0x90   :  { %v80_v28 = vsel %vm38_vm2, %v79_v21, 0.0  ;;  %v84_v45 = vmul.f32 %v82_v26, %v78_v27 }
  0x91   :  { %v83_v44 = vmul.f32 %v82_v26, %v80_v28  ;;  %v177_v28 = vstv %s392_s6 }
  0x92   :  { %v91_v29 = vpop.permute.xlu1 %90  ;;  %v59_v31 = vpop.permute.xlu0 %58 }
  0x93   :  { %v93_v33 = vsel %vm92_vm4, %v89_v18, %v91_v29  ;;  %v94_v34 = vsel %vm92_vm4, %v91_v29, %v89_v18  ;;  %v61_v35 = vsel %vm60_vm5, %v57_v15, %v59_v31  ;;  %v62_v36 = vsel %vm60_vm5, %v59_v31, %v57_v15 }
  0x94   :  { %v65_v38 = vsel %vm352_vm8, %v62_v36, 0.0  ;;  %v66_v39 = vsel %vm344_vm7, %v61_v35, 0.0  ;;  %v97_v46 = vsel %vm366_vm9, %v94_v34, 0.0  ;;  %v98_v47 = vsel %vm340_vm6, %v93_v33, 0.0 }
  0x95   :  { %v68_v41 = vmul.f32 %v67_v30, %v65_v38  ;;  %v69_v42 = vmul.f32 %v67_v30, %v66_v39  ;;  %v100_v57 = vmul.f32 %v99_v40, %v97_v46  ;;  %v101_v58 = vmul.f32 %v99_v40, %v98_v47 }
  0x96   :  { %v108_v48 = vpop.permute.xlu1 %107  ;;  %v106_v49 = vpop.permute.xlu0 %105 }
  0x97   :  { %v70_v50 = vadd.f32 %v68_v41, %v43_v37  ;;  %v71_v51 = vadd.f32 %v69_v42, %v43_v37  ;;  %v110_v52 = vsel %vm109_vm10, %v106_v49, %v108_v48  ;;  %v111_v53 = vsel %vm109_vm10, %v108_v48, %v106_v49 }
  0x98   :  { %v112_v54 = vsel %vm325_vm1, %v111_v53, 0.0  ;;  %v113_v55 = vsel %vm344_vm7, %v110_v52, 0.0  ;;  %v194_v42 = vstv %s415_s7 }
  0x99   :  { %v85_v59 = vadd.f32 %v83_v44, %v70_v50  ;;  %v86_v60 = vadd.f32 %v84_v45, %v71_v51  ;;  %v115_v61 = vmul.f32 %v114_v43, %v112_v54  ;;  %v116_v62 = vmul.f32 %v114_v43, %v113_v55 }
  0x9a   :  { %v139_v63 = vpop.permute.xlu1 %138  ;;  %v137_v1 = vpop.permute.xlu0 %136 }
  0x9b   :  { %v102_v2 = vadd.f32 %v100_v57, %v85_v59  ;;  %v103_v3 = vadd.f32 %v101_v58, %v86_v60  ;;  %v141_v4 = vsel %vm140_vm11, %v137_v1, %v139_v63  ;;  %v142_v5 = vsel %vm140_vm11, %v139_v63, %v137_v1 }
  0x9c   :  { %v143_v6 = vsel %vm332_vm3, %v141_v4, 0.0  ;;  %v144_v7 = vsel %vm340_vm6, %v142_v5, 0.0 }
  0x9d   :  { %v117_v8 = vadd.f32 %v115_v61, %v102_v2  ;;  %v118_v9 = vadd.f32 %v116_v62, %v103_v3  ;;  %v146_v14 = vmul.f32 %v145_v56, %v143_v6  ;;  %v147_v15 = vmul.f32 %v145_v56, %v144_v7 }
  0x9e   :  { %v154_v16 = vpop.permute.xlu1 %153  ;;  %v152_v18 = vpop.permute.xlu0 %151 }
  0x9f   :  { %v133_v19 = vadd.f32 %v307_v11, %v117_v8  ;;  %v134_v21 = vadd.f32 %v130_v0, %v118_v9  ;;  %v156_v25 = vsel %vm155_vm13, %v152_v18, %v154_v16  ;;  %v157_v26 = vsel %vm155_vm13, %v154_v16, %v152_v18 }
  0xa0   :  { %v160_v24 = vsel %vm325_vm1, %v156_v25, 0.0  ;;  %v161_v27 = vsel %vm410_vm14, %v157_v26, 0.0  ;;  %vm191_vm1 = vmand %vm41_vm12, %vm340_vm6 }
  0xa1   :  { %v148_v29 = vadd.f32 %v146_v14, %v133_v19  ;;  %v149_v30 = vadd.f32 %v147_v15, %v134_v21  ;;  %v163_v31 = vmul.f32 %v162_v17, %v160_v24  ;;  %v164_v32 = vmul.f32 %v162_v17, %v161_v27 }
  0xa2   :  { %v171_v33 = vpop.permute.xlu1 %170  ;;  %v169_v34 = vpop.permute.xlu0 %168 }
  0xa3   :  { %v165_v11 = vadd.f32 %v163_v31, %v148_v29  ;;  %v166_v35 = vadd.f32 %v164_v32, %v149_v30  ;;  %v173_v36 = vsel %vm172_vm15, %v169_v34, %v171_v33  ;;  %v174_v37 = vsel %vm172_vm15, %v171_v33, %v169_v34 }
  0xa4   :  { %v176_v20 = vsel %vm41_vm12, %v174_v37, 0.0  ;;  %v178_v38 = vmul.f32 %v177_v28, %v173_v36 }
  0xa5   :  { %v179_v39 = vmul.f32 %v177_v28, %v176_v20 }
  0xa6   :  { %v180_v40 = vadd.f32 %v178_v38, %v165_v11  ;;  %v186_v41 = vpop.permute.xlu1 %185  ;;  %v184_v43 = vpop.permute.xlu0 %183 }
  0xa7   :  { %v181_v44 = vadd.f32 %v179_v39, %v166_v35  ;;  %v188_v45 = vsel %vm187_vm0, %v184_v43, %v186_v41  ;;  %v189_v46 = vsel %vm187_vm0, %v186_v41, %v184_v43 }
  0xa8   :  { %v192_v47 = vsel %vm332_vm3, %v188_v45, 0.0  ;;  %v193_v48 = vsel %vm191_vm1, %v189_v46, 0.0 }
  0xa9   :  { %v195_v49 = vmul.f32 %v194_v42, %v192_v47  ;;  %v196_v50 = vmul.f32 %v194_v42, %v193_v48 }
  0xab   :  { %v197_v12 = vadd.f32 %v195_v49, %v180_v40  ;;  %v198_v51 = vadd.f32 %v196_v50, %v181_v44 }
  0xad   :  { %v236_v52 = vmul.f32 -1.442695, %v197_v12  ;;  %v237_v23 = vmul.f32 -1.442695, %v198_v51 }
  0xaf   :  { %249 = vpow2.f32 %v236_v52 }
  0xb0   :  { %251 = vpow2.f32 %v237_v23 }
  0xb9   :  { %v250_v13 = vpop.eup %249 }
  0xba   :  { %v252_v53 = vpop.eup %251  ;;  %v205_v54 = vadd.f32 1.0, %v250_v13 }
  0xbb   :  { %v206_v55 = vadd.f32 1.0, %v252_v53 }
  0xbc   :  { %253 = vrcp.f32 %v205_v54 }
  0xbd   :  { %255 = vrcp.f32 %v206_v55 }
  0xc6   :  { %v254_v56 = vpop.eup %253 }
  0xc7   :  { %v256_v57 = vpop.eup %255 }
  0xc8   :  { %v213_v58 = vcombine.low %v254_v56, %v256_v57 }
  0xca   :  { %238 = vst.sshfl [vmem:[%s440_s3] sm:$0x33 pattern:$0x76325410] %v213_v58 }
  0xcb   :  { %227 = vsyncpa [#allocation4], 1 }

</bundles_post_ra>
